<compile_context>
chip_gen: v7x
topology: tpu7x:2x2x1
jax: 0.10.0
libtpu: 0.0.40
codegen_flags: <defaults>
</compile_context>

<pallas_src>
import functools

import numpy as np
import jax
import jax.numpy as jnp
from jax.experimental import pallas as pl
from jax.experimental.pallas import tpu as pltpu

F32 = jnp.float32
MXU_DTYPE = jnp.bfloat16   # matmul operand dtype; accumulation stays f32


# ----------------------------------------------------------------------------
# small helpers
# ----------------------------------------------------------------------------
def _round_up(x, m):
    return ((x + m - 1) // m) * m


def _const_spec(a):
    """Whole-array BlockSpec with a constant index map (weights / stats)."""
    nd = a.ndim
    return pl.BlockSpec(a.shape, lambda *idx, _nd=nd: (0,) * _nd)


def _proj3(x, w, b):
    """x[..., 3] @ w[3, D] + b  without a K=3 MXU matmul (VPU mul-adds)."""
    return (x[..., 0:1] * w[0:1, :]
            + x[..., 1:2] * w[1:2, :]
            + x[..., 2:3] * w[2:3, :]) + b


def _gelu(x):
    # TODO(synk): torch nn.GELU uses exact erf; tanh approximation used here
    # for robust Mosaic lowering (EUP tanh).
    return jax.nn.gelu(x, approximate=True)


def _layernorm(x, g, b, eps=1e-5):
    mu = jnp.mean(x, axis=-1, keepdims=True)
    var = jnp.mean((x - mu) ** 2, axis=-1, keepdims=True)
    return (x - mu) * jax.lax.rsqrt(var + eps) * g + b


def _mm(x, w, b):
    """2-D MXU matmul: bf16 operands, f32 accumulation, f32 bias."""
    return jnp.dot(x.astype(MXU_DTYPE), w.astype(MXU_DTYPE),
                   preferred_element_type=jnp.float32) + b


def _dense3(x, w, b=0.0):
    """Channels-last 1x1-conv on a (rows, S, Cin) slab."""
    return jnp.einsum('bsc,cd->bsd',
                      x.astype(MXU_DTYPE), w.astype(MXU_DTYPE),
                      preferred_element_type=jnp.float32) + b


# ----------------------------------------------------------------------------
# Kernels
# ----------------------------------------------------------------------------
def pdist_kernel(c_ref, pT_ref, o_ref):
    """Squared distances center(1,G,3) vs points (1,3,N) -> (1,G,N).

    Lane-dense: N stays on the lane axis; the xyz reduction is three VPU
    mul-adds, no (G,N,3) intermediate, no cross-lane reduce.
    """
    c = c_ref[...].astype(jnp.float32)
    pT = pT_ref[...].astype(jnp.float32)
    d2 = None
    for k in range(3):
        diff = c[:, :, k:k + 1] - pT[:, k:k + 1, :]
        sq = diff * diff
        d2 = sq if d2 is None else d2 + sq
    o_ref[...] = d2.astype(o_ref.dtype)


def pe_pass1_kernel(x_ref, w1_ref, b1_ref, sc1_ref, sh1_ref,
                    w2_ref, b2_ref, w3g_ref, w3l_ref, b3_ref,
                    f_ref, stat_ref):
    """Patch-embed pass 1 on a (Tbg, S, 3) tile:
    conv1 -> BN1 (pre-fused scale/shift) -> ReLU -> conv2,
    plus per-tile sums / sum-of-squares of the conv3 pre-activation for BN2."""
    x = x_ref[...].astype(jnp.float32)                           # (Tbg, S, 3)
    h = _proj3(x, w1_ref[...], b1_ref[...])                      # (Tbg, S, 128)
    h = jnp.maximum(h * sc1_ref[...] + sh1_ref[...], 0.0)        # BN1 + ReLU
    f = _dense3(h, w2_ref[...], b2_ref[...])                     # (Tbg, S, 256)
    f_ref[...] = f.astype(f_ref.dtype)
    fg = jnp.max(f, axis=1, keepdims=True)                       # (Tbg, 1, 256)
    h3 = _dense3(fg, w3g_ref[...]) + _dense3(f, w3l_ref[...]) + b3_ref[...]
    s1 = jnp.sum(h3, axis=(0, 1), keepdims=True)                 # (1, 1, 512)
    s2 = jnp.sum(h3 * h3, axis=(0, 1), keepdims=True)            # (1, 1, 512)
    stat_ref[...] = jnp.concatenate([s1, s2], axis=1)            # (1, 2, 512)


def pe_pass2_kernel(f_ref, w3g_ref, w3l_ref, b3_ref, sc2_ref, sh2_ref,
                    w4_ref, b4_ref, o_ref):
    """Patch-embed pass 2: conv3 (global/local halves) -> BN2 -> ReLU ->
    conv4 -> per-group max-pool -> (Tbg, C) tokens."""
    f = f_ref[...].astype(jnp.float32)                           # (Tbg, S, 256)
    fg = jnp.max(f, axis=1, keepdims=True)
    h = _dense3(fg, w3g_ref[...]) + _dense3(f, w3l_ref[...]) + b3_ref[...]
    h = jnp.maximum(h * sc2_ref[...] + sh2_ref[...], 0.0)        # BN2 + ReLU
    ff = _dense3(h, w4_ref[...], b4_ref[...])                    # (Tbg, S, C)
    o_ref[...] = jnp.max(ff, axis=1).astype(o_ref.dtype)         # (Tbg, C)


def posmlp_kernel(x_ref, w1_ref, b1_ref, w2_ref, b2_ref, o_ref):
    """nn.Sequential(Linear(3,128), GELU, Linear(128,C)) on a row tile."""
    x = x_ref[...].astype(jnp.float32)
    h = _gelu(_proj3(x, w1_ref[...], b1_ref[...]))
    o_ref[...] = _mm(h, w2_ref[...], b2_ref[...]).astype(o_ref.dtype)


def linear_kernel(x_ref, w_ref, b_ref, o_ref):
    o_ref[...] = _mm(x_ref[...], w_ref[...], b_ref[...]).astype(o_ref.dtype)


def _stack_kernel(x_ref,
                  ln1g_ref, ln1b_ref, wqkv_ref, bqkv_ref,
                  wproj_ref, bproj_ref, ln2g_ref, ln2b_ref,
                  wfc1_ref, bfc1_ref, wfc2_ref, bfc2_ref,
                  lnfg_ref, lnfb_ref,
                  o_ref, x_scr, attn_scr, *, num_heads, t_valid):
    """Fused pre-LN transformer stack.

    grid = (batch_block, depth); a (Bb, T, C) activation slab stays resident
    in VMEM scratch across the depth axis while per-block bf16 weights are
    streamed via the BlockSpec index_map.  Activations are flattened to
    (Bb*T, C) for the MXU matmuls; per-head attention results are written
    directly into a VMEM scratch slice (no concat).  The final LayerNorm is
    fused into the last depth step.
    """
    d = pl.program_id(1)

    @pl.when(d == 0)
    def _():
        x_scr[...] = x_ref[...].astype(jnp.float32)

    x = x_scr[...]                                   # (Bb, T, C) f32
    Bb, T, C = x.shape
    H = num_heads
    Dh = C // H
    scale = Dh ** -0.5

    # ---- MHSA -------------------------------------------------------------
    h = _layernorm(x, ln1g_ref[...], ln1b_ref[...])
    qkv = _mm(h.reshape(Bb * T, C), wqkv_ref[...], bqkv_ref[...])
    qkv = qkv.reshape(Bb, T, 3 * C)
    q = qkv[..., 0:C]
    k = qkv[..., C:2 * C]
    v = qkv[..., 2 * C:3 * C]

    # exact key-padding mask (only active when T was padded to a sublane mult)
    kmask = None
    if T > t_valid:
        kmask = jax.lax.broadcasted_iota(jnp.int32, (1, 1, T), 2) < t_valid

    # TODO(synk): batched-head einsum ('bqhd,bkhd->bhqk') avoided; per-head
    # slices stay on the lane axis and write directly into attn_scr.
    for hi in range(H):
        sl = slice(hi * Dh, (hi + 1) * Dh)
        qh = q[..., sl].astype(MXU_DTYPE)
        kh = k[..., sl].astype(MXU_DTYPE)
        vh = v[..., sl].astype(MXU_DTYPE)
        a = jnp.einsum('bqd,bkd->bqk', qh, kh,
                       preferred_element_type=jnp.float32) * scale
        if kmask is not None:
            a = jnp.where(kmask, a, -1e30)
        a = a - jnp.max(a, axis=-1, keepdims=True)
        e = jnp.exp(a)
        p = e * pl.reciprocal(jnp.sum(e, axis=-1, keepdims=True), approx=True)
        attn_scr[:, :, sl] = jnp.einsum('bqk,bkd->bqd', p.astype(MXU_DTYPE), vh,
                                        preferred_element_type=jnp.float32)
    attn = _mm(attn_scr[...].reshape(Bb * T, C), wproj_ref[...], bproj_ref[...])
    x = x + attn.reshape(Bb, T, C)

    # ---- MLP --------------------------------------------------------------
    h = _layernorm(x, ln2g_ref[...], ln2b_ref[...]).reshape(Bb * T, C)
    h = _gelu(_mm(h, wfc1_ref[...], bfc1_ref[...]))
    h = _mm(h, wfc2_ref[...], bfc2_ref[...])
    x = x + h.reshape(Bb, T, C)
    x_scr[...] = x

    @pl.when(d == pl.num_programs(1) - 1)
    def _():
        o_ref[...] = _layernorm(x, lnfg_ref[...], lnfb_ref[...]).astype(o_ref.dtype)


# ----------------------------------------------------------------------------
# Pallas wrappers
# ----------------------------------------------------------------------------
def pairwise_sqdist(center, pts):
    """(B,G,3) x (B,N,3) -> (B,G,N) squared distances, gridded over batch."""
    B, G, _ = center.shape
    N = pts.shape[1]
    ptsT = jnp.swapaxes(pts, 1, 2)                       # (B, 3, N)
    return pl.pallas_call(
        pdist_kernel,
        out_shape=jax.ShapeDtypeStruct((B, G, N), F32),
        grid=(B,),
        in_specs=[pl.BlockSpec((1, G, 3), lambda b: (b, 0, 0)),
                  pl.BlockSpec((1, 3, N), lambda b: (b, 0, 0))],
        out_specs=pl.BlockSpec((1, G, N), lambda b: (b, 0, 0)),
        compiler_params=pltpu.CompilerParams(dimension_semantics=("parallel",)),
    )(center, ptsT)


def pallas_rows(kernel, out_cols, x, *weights, out_dtype=F32, max_rows=512):
    """Grid a row-wise kernel over the first axis of `x`; weights whole."""
    M = x.shape[0]
    Mp = _round_up(M, 8)
    rb = min(max_rows, Mp)
    Mp = _round_up(Mp, rb)
    if Mp != M:
        x = jnp.pad(x, [(0, Mp - M)] + [(0, 0)] * (x.ndim - 1))
    nd1 = x.ndim - 1
    xspec = pl.BlockSpec((rb,) + x.shape[1:],
                         lambda i, _n=nd1: (i,) + (0,) * _n)
    out = pl.pallas_call(
        kernel,
        out_shape=jax.ShapeDtypeStruct((Mp, out_cols), out_dtype),
        grid=(Mp // rb,),
        in_specs=[xspec] + [_const_spec(w) for w in weights],
        out_specs=pl.BlockSpec((rb, out_cols), lambda i: (i, 0)),
        compiler_params=pltpu.CompilerParams(dimension_semantics=("parallel",)),
    )(x, *weights)
    return out[:M] if Mp != M else out


def _choose_row_tile(n, limit=256):
    if n <= limit:
        return n
    for t in range(limit, 7, -1):
        if n % t == 0 and t % 8 == 0:
            return t
    # TODO(synk): pad B*G and mask the BN statistic sums for awkward counts.
    return n


def patch_embed(neighborhood, params, C):
    """PointNet-style patch embedding (B*G, S, 3) -> (B*G, C), gridded over
    B*G with exact train-mode BatchNorm batch statistics (two passes)."""
    BG, S, _ = neighborhood.shape
    n = BG * S

    # BN1 stats analytically from input moments (conv1 is affine in x).
    xf = neighborhood.reshape(n, 3).astype(F32)
    ex = jnp.mean(xf, axis=0)                                  # (3,)
    exx = xf.T @ xf / n                                        # (3, 3)
    w1 = params['pe_w1']
    s_mean = ex @ w1                                           # (128,)
    s_sq = jnp.einsum('kc,kl,lc->c', w1, exx, w1)              # E[(x@w1)^2]
    mu1 = s_mean + params['pe_b1'][0]
    var1 = s_sq - s_mean ** 2
    sc1 = params['pe_g1'] * jax.lax.rsqrt(var1 + 1e-5)         # (1, 128)
    sh1 = params['pe_be1'] - mu1 * sc1

    w2b = params['pe_w2'].astype(MXU_DTYPE)
    w3gb = params['pe_w3g'].astype(MXU_DTYPE)
    w3lb = params['pe_w3l'].astype(MXU_DTYPE)
    w4b = params['pe_w4'].astype(MXU_DTYPE)

    tbg = _choose_row_tile(BG)
    n_tiles = BG // tbg
    vmem_limit = int(min(64 << 20,
                         max(16 << 20,
                             8 * tbg * S * (3 + 128 + 256 + 512 + 512) * 4)))
    cp = pltpu.CompilerParams(dimension_semantics=("parallel",),
                              vmem_limit_bytes=vmem_limit)

    # pass 1: conv1 -> BN1 -> ReLU -> conv2, plus BN2 partial statistics
    f, stats = pl.pallas_call(
        pe_pass1_kernel,
        out_shape=(jax.ShapeDtypeStruct((BG, S, 256), F32),
                   jax.ShapeDtypeStruct((n_tiles, 2, 512), F32)),
        grid=(n_tiles,),
        in_specs=[pl.BlockSpec((tbg, S, 3), lambda i: (i, 0, 0)),
                  _const_spec(params['pe_w1']), _const_spec(params['pe_b1']),
                  _const_spec(sc1), _const_spec(sh1),
                  _const_spec(w2b), _const_spec(params['pe_b2']),
                  _const_spec(w3gb), _const_spec(w3lb),
                  _const_spec(params['pe_b3'])],
        out_specs=(pl.BlockSpec((tbg, S, 256), lambda i: (i, 0, 0)),
                   pl.BlockSpec((1, 2, 512), lambda i: (i, 0, 0))),
        compiler_params=cp,
    )(neighborhood, params['pe_w1'], params['pe_b1'], sc1, sh1,
      w2b, params['pe_b2'], w3gb, w3lb, params['pe_b3'])

    ssum = jnp.sum(stats, axis=0)                              # (2, 512)
    mu2 = ssum[0] / n
    var2 = ssum[1] / n - mu2 ** 2
    sc2 = params['pe_g3'] * jax.lax.rsqrt(var2 + 1e-5)         # (1, 512)
    sh2 = params['pe_be3'] - mu2 * sc2

    # pass 2: conv3 (global/local halves) -> BN2 -> ReLU -> conv4 -> max-pool
    tokens = pl.pallas_call(
        pe_pass2_kernel,
        out_shape=jax.ShapeDtypeStruct((BG, C), F32),
        grid=(n_tiles,),
        in_specs=[pl.BlockSpec((tbg, S, 256), lambda i: (i, 0, 0)),
                  _const_spec(w3gb), _const_spec(w3lb),
                  _const_spec(params['pe_b3']),
                  _const_spec(sc2), _const_spec(sh2),
                  _const_spec(w4b), _const_spec(params['pe_b4'])],
        out_specs=pl.BlockSpec((tbg, C), lambda i: (i, 0)),
        compiler_params=cp,
    )(f, w3gb, w3lb, params['pe_b3'], sc2, sh2, w4b, params['pe_b4'])
    return tokens


def _stack_vmem_bytes(bb, T, C):
    act = 2 * bb * T * C * 4                 # x_scr + attn_scr (f32)
    io = 2 * 2 * bb * T * C * 4              # in/out x blocks, double-buffered
    wmat = 12 * C * C * 2                    # bf16 qkv/proj/fc1/fc2 weights
    wsmall = (3 * C + C + 4 * C + C + 6 * C) * 4
    return act + io + 2 * (wmat + wsmall)


def _choose_batch_block(B, T, C, budget=24 << 20):
    bb = 1
    for cand in range(1, B + 1):
        if B % cand == 0 and _stack_vmem_bytes(cand, T, C) <= budget:
            bb = cand
    # TODO(synk): on v7x prefer >=2 batch blocks so both TensorCores get work.
    return bb


def transformer_stack(x, sp, lnf_g, lnf_b, num_heads):
    """Run a stack of pre-LN blocks (+ final LN) as one depth-gridded call."""
    B, T, C = x.shape
    depth = sp['wqkv'].shape[0]

    Tp = max(_round_up(T, 8), 8)
    if Tp != T:
        x = jnp.pad(x, ((0, 0), (0, Tp - T), (0, 0)))
    bb = _choose_batch_block(B, Tp, C)

    # bf16 matmul weights (half the per-step weight DMA); LN/bias stay f32.
    wqkv = sp['wqkv'].astype(MXU_DTYPE)
    wproj = sp['wproj'].astype(MXU_DTYPE)
    wfc1 = sp['wfc1'].astype(MXU_DTYPE)
    wfc2 = sp['wfc2'].astype(MXU_DTYPE)

    x_map = lambda b, d: (b, 0, 0)
    w_map = lambda b, d: (d, 0, 0)
    c_map = lambda b, d: (0, 0)

    def wspec(trailing):
        return pl.BlockSpec((None,) + trailing, w_map)

    in_specs = [
        pl.BlockSpec((bb, Tp, C), x_map),        # x
        wspec((1, C)), wspec((1, C)),            # ln1 gamma / beta
        wspec((C, 3 * C)), wspec((1, 3 * C)),    # qkv weight / bias
        wspec((C, C)), wspec((1, C)),            # proj weight / bias
        wspec((1, C)), wspec((1, C)),            # ln2 gamma / beta
        wspec((C, 4 * C)), wspec((1, 4 * C)),    # fc1 weight / bias
        wspec((4 * C, C)), wspec((1, C)),        # fc2 weight / bias
        pl.BlockSpec((1, C), c_map),             # final LN gamma
        pl.BlockSpec((1, C), c_map),             # final LN beta
    ]
    out_spec = pl.BlockSpec((bb, Tp, C), x_map)

    vmem_limit = int(min(64 << 20,
                         max(16 << 20, 2 * _stack_vmem_bytes(bb, Tp, C))))
    out = pl.pallas_call(
        functools.partial(_stack_kernel, num_heads=num_heads, t_valid=T),
        out_shape=jax.ShapeDtypeStruct((B, Tp, C), x.dtype),
        grid=(B // bb, depth),
        in_specs=in_specs,
        out_specs=out_spec,
        scratch_shapes=[pltpu.VMEM((bb, Tp, C), jnp.float32),
                        pltpu.VMEM((bb, Tp, C), jnp.float32)],
        compiler_params=pltpu.CompilerParams(
            dimension_semantics=("parallel", "arbitrary"),
            vmem_limit_bytes=vmem_limit),
    )(x, sp['ln1_g'], sp['ln1_b'], wqkv, sp['bqkv'],
      wproj, sp['bproj'], sp['ln2_g'], sp['ln2_b'],
      wfc1, sp['bfc1'], wfc2, sp['bfc2'], lnf_g, lnf_b)
    return out[:, :T] if Tp != T else out


# ----------------------------------------------------------------------------
# JAX glue
# ----------------------------------------------------------------------------
def fps(pts, num_group):
    """Farthest point sampling (deterministic, starts at point 0)."""
    B, N, _ = pts.shape

    def one(p):
        def body(i, state):
            idxs, dists = state
            last = p[idxs[i - 1]]
            d = jnp.sum((p - last) ** 2, axis=-1)
            dists = jnp.minimum(dists, d)
            idxs = idxs.at[i].set(jnp.argmax(dists).astype(jnp.int32))
            return idxs, dists

        idxs0 = jnp.zeros((num_group,), jnp.int32)
        dists0 = jnp.full((N,), jnp.inf, F32)
        idxs, _ = jax.lax.fori_loop(1, num_group, body, (idxs0, dists0))
        return p[idxs]

    return jax.vmap(one)(pts)


def init_params(key, cfg):
    C = cfg['embed_dim']
    S = cfg['group_size']
    Q = cfg['img_queries'] + cfg['text_queries']

    def nrm(k, shape):
        # matches _init_weights: normal(mean=0.02, std=0.01), bias = 0
        return (0.02 + 0.01 * jax.random.normal(k, shape, F32)).astype(F32)

    keys = iter(jax.random.split(key, 128))
    p = {}
    # PatchEmbedding (PointNet-style 1x1 convs as matmuls)
    p['pe_w1'] = nrm(next(keys), (3, 128));   p['pe_b1'] = jnp.zeros((1, 128), F32)
    p['pe_g1'] = jnp.ones((1, 128), F32);     p['pe_be1'] = jnp.zeros((1, 128), F32)
    p['pe_w2'] = nrm(next(keys), (128, 256)); p['pe_b2'] = jnp.zeros((1, 256), F32)
    p['pe_w3g'] = nrm(next(keys), (256, 512))       # global-feature half of w3
    p['pe_w3l'] = nrm(next(keys), (256, 512))       # local-feature half of w3
    p['pe_b3'] = jnp.zeros((1, 512), F32)
    p['pe_g3'] = jnp.ones((1, 512), F32);     p['pe_be3'] = jnp.zeros((1, 512), F32)
    p['pe_w4'] = nrm(next(keys), (512, C));   p['pe_b4'] = jnp.zeros((1, C), F32)
    # pos_embed / decoder_pos_embed MLPs
    for name in ('pos', 'dpos'):
        p[f'{name}_w1'] = nrm(next(keys), (3, 128))
        p[f'{name}_b1'] = jnp.zeros((1, 128), F32)
        p[f'{name}_w2'] = nrm(next(keys), (128, C))
        p[f'{name}_b2'] = jnp.zeros((1, C), F32)

    def block_params(k):
        ks = jax.random.split(k, 4)
        return dict(
            ln1_g=jnp.ones((1, C), F32), ln1_b=jnp.zeros((1, C), F32),
            wqkv=nrm(ks[0], (C, 3 * C)), bqkv=jnp.zeros((1, 3 * C), F32),
            wproj=nrm(ks[1], (C, C)), bproj=jnp.zeros((1, C), F32),
            ln2_g=jnp.ones((1, C), F32), ln2_b=jnp.zeros((1, C), F32),
            wfc1=nrm(ks[2], (C, 4 * C)), bfc1=jnp.zeros((1, 4 * C), F32),
            wfc2=nrm(ks[3], (4 * C, C)), bfc2=jnp.zeros((1, C), F32),
        )

    def stack_blocks(n):
        blocks = [block_params(next(keys)) for _ in range(n)]
        return {k: jnp.stack([b[k] for b in blocks], axis=0) for k in blocks[0]}

    p['enc_blocks'] = stack_blocks(cfg['depth'])
    p['dec_blocks'] = stack_blocks(cfg['decoder_depth'])
    p['norm_g'] = jnp.ones((1, C), F32);     p['norm_b'] = jnp.zeros((1, C), F32)
    p['dec_norm_g'] = jnp.ones((1, C), F32); p['dec_norm_b'] = jnp.zeros((1, C), F32)
    p['global_query'] = jnp.zeros((1, Q, C), F32)   # nn.Parameter(torch.zeros(...))
    p['mask_token'] = jnp.zeros((1, 1, C), F32)
    p['head_w'] = nrm(next(keys), (C, 3 * S))
    p['head_b'] = jnp.zeros((1, 3 * S), F32)
    return p


def mask_transformer_forward(params, pts, cfg, mask_np):
    """forward_mae(pts) -> (generated_points, gt_points, global_features)."""
    B, N, _ = pts.shape
    G, S, C = cfg['num_group'], cfg['group_size'], cfg['embed_dim']
    Q = cfg['img_queries'] + cfg['text_queries']
    num_mask = int(cfg['mask_ratio'] * G)
    Gvis = G - num_mask

    # ---- group divider: FPS centers + KNN neighborhoods -------------------
    center = fps(pts, G)                                         # (B, G, 3)
    d2 = pairwise_sqdist(center, pts)                            # (B, G, N)
    _, knn_idx = jax.lax.top_k(-d2, S)                           # (B, G, S)
    nbr = jax.vmap(lambda p, i: p[i])(pts, knn_idx)              # (B, G, S, 3)
    neighborhood = nbr - center[:, :, None, :]

    # ---- random center mask (host-side, deterministic) --------------------
    vis_idx = jnp.asarray(
        np.stack([np.where(~mask_np[b])[0] for b in range(B)]), jnp.int32)
    msk_idx = jnp.asarray(
        np.stack([np.where(mask_np[b])[0] for b in range(B)]), jnp.int32)

    # ---- patch embedding (gridded two-pass, exact batch-stat BN) ----------
    tokens = patch_embed(neighborhood.reshape(B * G, S, 3),
                         params, C).reshape(B, G, C)

    # ---- positional embeddings (row-gridded MLP kernels) -------------------
    centers_flat = center.reshape(B * G, 3)
    pos = pallas_rows(posmlp_kernel, C, centers_flat,
                      params['pos_w1'], params['pos_b1'],
                      params['pos_w2'].astype(MXU_DTYPE),
                      params['pos_b2']).reshape(B, G, C)
    dpos = pallas_rows(posmlp_kernel, C, centers_flat,
                       params['dpos_w1'], params['dpos_b1'],
                       params['dpos_w2'].astype(MXU_DTYPE),
                       params['dpos_b2']).reshape(B, G, C)

    def gather(t, idx):
        return jnp.take_along_axis(t, idx[:, :, None], axis=1)

    # ---- MAE encoder (fused block stack + final norm) ----------------------
    # TODO(synk): ReCon's MAEExtractor routes the global queries through
    # stop-grad cross-attention; simplified here to joint self-attention.
    x_vis = gather(tokens, vis_idx)                              # (B, Gvis, C)
    pos_vis = gather(pos, vis_idx)
    gq = jnp.broadcast_to(params['global_query'], (B, Q, C))
    x = jnp.concatenate([x_vis + pos_vis, gq], axis=1)           # (B, Gvis+Q, C)
    x = transformer_stack(x, params['enc_blocks'],
                          params['norm_g'], params['norm_b'], cfg['num_heads'])
    local_features = x[:, :Gvis]                                 # (B, Gvis, C)
    global_features = x[:, Gvis:Gvis + Q]                        # (B, Q, C)

    # ---- MAE decoder (fused block stack + final norm) ----------------------
    dpos_vis = gather(dpos, vis_idx)
    dpos_msk = gather(dpos, msk_idx)
    mtok = jnp.broadcast_to(params['mask_token'], (B, num_mask, C))
    xd = jnp.concatenate([local_features + dpos_vis, mtok + dpos_msk], axis=1)
    xd = transformer_stack(xd, params['dec_blocks'],
                           params['dec_norm_g'], params['dec_norm_b'],
                           cfg['num_heads'])
    # LayerNorm is per-token, so norm-then-slice == slice-then-norm.
    x_rec = xd[:, Gvis:Gvis + num_mask]                          # (B, num_mask, C)

    # ---- reconstruction head (lane-dense padded output) --------------------
    P = _round_up(3 * S, 128)
    head_w = jnp.pad(params['head_w'],
                     ((0, 0), (0, P - 3 * S))).astype(MXU_DTYPE)
    head_b = jnp.pad(params['head_b'], ((0, 0), (0, P - 3 * S)))
    gen = pallas_rows(linear_kernel, P, x_rec.reshape(B * num_mask, C),
                      head_w, head_b)
    generated_points = gen[:, :3 * S].reshape(B * num_mask, S, 3)

    gt_points = jnp.take_along_axis(
        neighborhood.reshape(B, G, S * 3), msk_idx[:, :, None],
        axis=1).reshape(B * num_mask, S, 3)

    return generated_points, gt_points, global_features


# ----------------------------------------------------------------------------
if __name__ == "__main__":
    cfg = dict(
        embed_dim=32,
        num_heads=2,
        depth=2,
        decoder_depth=1,
        num_group=8,
        group_size=16,
        mask_ratio=0.5,
        img_queries=1,
        text_queries=1,
        with_color=False,      # input_channel = 3
        mask_type='rand',      # MAE path
    )

    key = jax.random.PRNGKey(0)
    pkey, xkey = jax.random.split(key)
    params = init_params(pkey, cfg)

    B, N = 2, 64
    pts = jax.random.normal(xkey, (B, N, 3), F32)

    # deterministic _mask_center_rand equivalent
    rng = np.random.RandomState(0)
    G = cfg['num_group']
    num_mask = int(cfg['mask_ratio'] * G)
    mask_np = np.zeros((B, G), dtype=bool)
    for i in range(B):
        m = np.hstack([np.zeros(G - num_mask), np.ones(num_mask)])
        rng.shuffle(m)
        mask_np[i] = m.astype(bool)

    gen_pts, gt_pts, glob_feats = mask_transformer_forward(params, pts, cfg, mask_np)
    jax.block_until_ready((gen_pts, gt_pts, glob_feats))

    assert gen_pts.shape == (B * num_mask, cfg['group_size'], 3)
    assert gt_pts.shape == (B * num_mask, cfg['group_size'], 3)
    assert glob_feats.shape == (B, cfg['img_queries'] + cfg['text_queries'],
                                cfg['embed_dim'])
    print("KERNEL_OK")
</pallas_src>

<mosaic_0001>
module attributes {stable_mosaic.version = 11 : i64} {
  func.func @pdist_kernel(%arg0: i32, %arg1: memref<1x8x3xf32, #tpu.memory_space<vmem>>, %arg2: memref<1x3x64xf32, #tpu.memory_space<vmem>>, %arg3: memref<1x8x64xf32, #tpu.memory_space<vmem>>) attributes {dimension_semantics = [#tpu.dimension_semantics<parallel>], iteration_bounds = array<i64: 2>, scalar_prefetch = 0 : i64, scratch_operands = 0 : i64, tpu.core_type = #tpu.core_type<tc>, window_params = [{transform_indices = @transform_0, window_bounds = array<i64: 1, 8, 3>}, {transform_indices = @transform_1, window_bounds = array<i64: 1, 3, 64>}, {transform_indices = @transform_2, window_bounds = array<i64: 1, 8, 64>}]} {
    %c0 = arith.constant 0 : index
    %c0_0 = arith.constant 0 : index
    %c0_1 = arith.constant 0 : index
    %0 = vector.load %arg1[%c0, %c0_0, %c0_1] : memref<1x8x3xf32, #tpu.memory_space<vmem>>, vector<1x8x3xf32>
    %c0_2 = arith.constant 0 : index
    %c0_3 = arith.constant 0 : index
    %c0_4 = arith.constant 0 : index
    %1 = vector.load %arg2[%c0_2, %c0_3, %c0_4] : memref<1x3x64xf32, #tpu.memory_space<vmem>>, vector<1x3x64xf32>
    %2 = vector.extract_strided_slice %0 {offsets = [0, 0, 0], sizes = [1, 8, 1], strides = [1, 1, 1]} : vector<1x8x3xf32> to vector<1x8x1xf32>
    %3 = vector.extract_strided_slice %1 {offsets = [0, 0, 0], sizes = [1, 1, 64], strides = [1, 1, 1]} : vector<1x3x64xf32> to vector<1x1x64xf32>
    %4 = vector.broadcast %2 : vector<1x8x1xf32> to vector<1x8x64xf32>
    %5 = vector.broadcast %3 : vector<1x1x64xf32> to vector<1x8x64xf32>
    %6 = arith.subf %4, %5 : vector<1x8x64xf32>
    %7 = arith.mulf %6, %6 : vector<1x8x64xf32>
    %8 = vector.extract_strided_slice %0 {offsets = [0, 0, 1], sizes = [1, 8, 1], strides = [1, 1, 1]} : vector<1x8x3xf32> to vector<1x8x1xf32>
    %9 = vector.extract_strided_slice %1 {offsets = [0, 1, 0], sizes = [1, 1, 64], strides = [1, 1, 1]} : vector<1x3x64xf32> to vector<1x1x64xf32>
    %10 = vector.broadcast %8 : vector<1x8x1xf32> to vector<1x8x64xf32>
    %11 = vector.broadcast %9 : vector<1x1x64xf32> to vector<1x8x64xf32>
    %12 = arith.subf %10, %11 : vector<1x8x64xf32>
    %13 = arith.mulf %12, %12 : vector<1x8x64xf32>
    %14 = arith.addf %7, %13 : vector<1x8x64xf32>
    %15 = vector.extract_strided_slice %0 {offsets = [0, 0, 2], sizes = [1, 8, 1], strides = [1, 1, 1]} : vector<1x8x3xf32> to vector<1x8x1xf32>
    %16 = vector.extract_strided_slice %1 {offsets = [0, 2, 0], sizes = [1, 1, 64], strides = [1, 1, 1]} : vector<1x3x64xf32> to vector<1x1x64xf32>
    %17 = vector.broadcast %15 : vector<1x8x1xf32> to vector<1x8x64xf32>
    %18 = vector.broadcast %16 : vector<1x1x64xf32> to vector<1x8x64xf32>
    %19 = arith.subf %17, %18 : vector<1x8x64xf32>
    %20 = arith.mulf %19, %19 : vector<1x8x64xf32>
    %21 = arith.addf %14, %20 : vector<1x8x64xf32>
    %c0_5 = arith.constant 0 : index
    %c0_6 = arith.constant 0 : index
    %c0_7 = arith.constant 0 : index
    %22 = vector.load %arg3[%c0_5, %c0_6, %c0_7] : memref<1x8x64xf32, #tpu.memory_space<vmem>>, vector<1x8x64xf32>
    tpu.vector_store %arg3[%c0_5, %c0_6, %c0_7], %21 {strides = array<i32>} : memref<1x8x64xf32, #tpu.memory_space<vmem>>, vector<1x8x64xf32>,
    return
  }
  func.func @transform_0(%arg0: i32) -> (i32, i32, i32) {
    %c0_i32 = arith.constant 0 : i32
    %c0_i32_0 = arith.constant 0 : i32
    %c0_i32_1 = arith.constant 0 : i32
    return %arg0, %c0_i32, %c0_i32_0 : i32, i32, i32
  }
  func.func @transform_1(%arg0: i32) -> (i32, i32, i32) {
    %c0_i32 = arith.constant 0 : i32
    %c0_i32_0 = arith.constant 0 : i32
    %c0_i32_1 = arith.constant 0 : i32
    return %arg0, %c0_i32, %c0_i32_0 : i32, i32, i32
  }
  func.func @transform_2(%arg0: i32) -> (i32, i32, i32) {
    %c0_i32 = arith.constant 0 : i32
    %c0_i32_0 = arith.constant 0 : i32
    %c0_i32_1 = arith.constant 0 : i32
    return %arg0, %c0_i32, %c0_i32_0 : i32, i32, i32
  }
}

</mosaic_0001>

<bundles_post_ra>
// kernel: tpu_custom_call.1
= control target key start
LH: loop header
LB: loop body
LE: loop exit
PB: predicated region body
PF: predicated region fallthrough
CT: control target
= control target key end

     0   :  { %7 = vsyncpa [#allocation3], 0  ;;  %s521_s0 = inlined_call_operand.vmem [shape: f32[2,8,3], index: 0, kind: input, shape index: {}]   ;;  %s522_s1 = inlined_call_operand.vmem [shape: f32[2,3,64], index: 1, kind: input, shape index: {}]   ;;  %s523_s2 = inlined_call_operand.hbm [shape: f32[2,8,64], index: 2, kind: output, shape index: {}]  }
   0x1   :  { %9 = vsyncpa [#allocation3 + $0x1], 0  ;;  %s418_s9 = smov 0   ;;  %s420_s10 = smov 0  }
   0x2   :  { %s422_s11 = smov 0   ;;  %s424_s12 = smov 0  }
   0x3 LB: > { %s439_s13 = sadd.s32 4294967295, %s397_s12   ;;  %s278_s14 = sadd.s32 4294967294, %s397_s12   ;;  %s397_s12 = sphi %s424_s12, %s529_s12   ;;  %s393_s11 = sphi %s422_s11, %s528_s11   ;;  %s389_s10 = sphi %s420_s10, %s527_s10   ;;  %s385_s9 = sphi %s418_s9, %s526_s9  }
   0x4   : > { %s443_s15 = sadd.s32 1, %s397_s12   ;;  %s74_s16 = sadd.s32 1, %s393_s11 }
   0x5   : > { %s71_s17 = ssub.s32 %s397_s12, %s443_s15  ;;  %p84_p0 = scmp.ne.s32.totalorder %s393_s11, %s389_s10 }
   0x6   : > { %p72_p1 = scmp.eq.s32.totalorder %s71_s17, 0  ;;  %p85_p2 = scmp.eq.s32.totalorder %s439_s13, 1 }
   0x7   : > { %p90_p3 = scmp.ne.s32.totalorder %s389_s10, %s385_s9  ;;  %p91_p4 = scmp.eq.s32.totalorder %s278_s14, 1 }
   0x8   : > { %s454_s18 = scalar_select %p72_p1, %s393_s11, %s74_s16  }
   0x9   : > { %p456_p5 = por %p85_p2, %p84_p0  ;;  %p460_p6 = por %p91_p4, %p90_p3 }
   0xa   : > { %p281_p7 = scmp.ge.s32.totalorder %s397_s12, 1  ;;  %p123_p8 = scmp.lt.s32.totalorder %s397_s12, 3 }
   0xc   : > { %p124_p9 = pnand %p281_p7, %p123_p8 }
   0xd   : > { %p148_p10 = scmp.lt.s32.totalorder (!%p124_p9), %s439_s13, 1  ;;  %v399_v0 = vmov (!%p124_p9), 0   ;;  %v400_v1 = vmov (!%p124_p9), 2   ;;  %v401_v3 = vmov (!%p124_p9), 1   ;;  %v163_v4 = vlaneseq (!%p124_p9)  ;;  %s145_s30 = sand.u32 (!%p124_p9), 1, %s389_s10  }
   0xe   : > { %127 = sbr.rel (%p124_p9) target bundleno = 181 (0xb5), region = 28  ;;  %331 = vset.pattern.permute.xlu0 (!%p124_p9), %v399_v0  ;;  %333 = vset.pattern.permute.xlu1 (!%p124_p9), %v400_v1  ;;  %s282_s3 = sshll.u32 (!%p124_p9), %s145_s30, 3  ;;  %vm191_vm0 = vcmask (!%p124_p9), 523264  }
   0xf   : > { %v164_v5 = vshrl.u32 (!%p124_p9), %v163_v4, 7  ;;  %s286_s4 = sshll.u32 (!%p124_p9), %s439_s13, 7  ;;  %s147_s5 = scalar_lea.vmem (!%p124_p9), [#allocation2], %s282_s3 }
  0x10   : > { %s207_s6 = sshll.u32 (!%p124_p9), %s147_s5, 4  ;;  %s479_s14 = scalar_lea.hbm (!%p124_p9), %s523_s2, %s286_s4  ;;  %s481_s6 = int_to_ptr.vmem [resolvable:$true] %s207_s6 }
  0x11   : > { %v165_v6 = vsub.s32 (!%p124_p9), 0, %v164_v5  ;;  %v186_v7 = vsub.s32 (!%p124_p9), 2, %v164_v5  ;;  %v175_v9 = vsub.s32 (!%p124_p9), 1, %v164_v5  ;;  %s194_s16 = scalar_lea.sflag (!%p124_p9), [#allocation3], %s145_s30  ;;  %s335_s17 = scalar_lea.vmem (!%p124_p9), %s481_s6, 128 }
  0x12   : > { %p336_p11 = scmp.ne.s32.totalorder (!%p124_p9), %s481_s6, %s335_s17 }
  0x14   : > { %p337_p12 = pnand (!%p124_p9), %p336_p11, %p456_p5 }
  0x15   : > { %s149_s21 = scalar_select %p148_p10, %s439_s13, 1 }
  0x16   : > { %p338_p13 = pneg %p337_p12  ;;  %s402_s13 = smov [#allocation2]  }
  0x17   : > { %s283_s22 = sshll.u32 %s149_s21, 3  ;;  %s284_s26 = sshll.u32 %s149_s21, 2 }
  0x18   : > { %s151_s25 = scalar_lea.vmem %s521_s0, %s283_s22  ;;  %s155_s29 = scalar_lea.vmem %s522_s1, %s284_s26 }
  0x19   : > { %v156_v2 = vld [vmem:[%s151_s25] sm:$0xff]  ;;  %s339_s21 = sshll.u32 %s402_s13, 4  ;;  %s340_s21 = int_to_ptr.vmem [resolvable:$false] %s339_s21 }
  0x1a   : > { %160 = vperm.xlu0 %331, %v156_v2   ;;  %181 = vperm.xlu1 %333, %v156_v2   ;;  %v157_v8 = vld [vmem:[%s155_s29] sm:$0x7]  ;;  %s341_s22 = scalar_lea.vmem %s340_s21, 256  ;;  %p342_p0 = scmp.lt.s32.totalorder %s481_s6, %s340_s21 }
  0x1b   : > { %v166_v10 = vrot.slane %v157_v8, %v165_v6  ;;  %v187_v12 = vrot.slane %v157_v8, %v186_v7  ;;  %v176_v14 = vrot.slane %v157_v8, %v175_v9  ;;  %p343_p1 = scmp.lt.s32.totalorder %s341_s22, %s335_s17 }
  0x1d   : > { %p344_p2 = por %p343_p1, %p342_p0 }
  0x1e   : > { %332 = vset.pattern.permute.xlu0 %v401_v3 }
  0x1f   : > { %170 = vperm.xlu0 %332, %v156_v2   ;;  %p345_p3 = pnand %p344_p2, %p338_p13 }
  0x23   : > { %334 = vset.pattern.permute.xlu0 %v400_v1 }
  0x99   : > { %v161_v11 = vpop.permute.xlu0 %160  ;;  %v182_v13 = vpop.permute.xlu1 %181 }
  0x9a   : > { %v167_v15 = vsub.f32 %v161_v11, %v166_v10  ;;  %v188_v16 = vsub.f32 %v182_v13, %v187_v12 }
  0x9c   : > { %v168_v19 = vmul.f32 %v167_v15, %v167_v15  ;;  %v189_v21 = vmul.f32 %v188_v16, %v188_v16 }
  0x9e   : > { %v171_v17 = vpop.permute.xlu0 %170 }
  0x9f   : > { %v177_v18 = vsub.f32 %v171_v17, %v176_v14 }
  0xa1   : > { %v178_v20 = vmul.f32 %v177_v18, %v177_v18 }
  0xa3   : > { %v179_v22 = vadd.f32 %v178_v20, %v168_v19 }
  0xa5   : > { %v190_v23 = vadd.f32 %v189_v21, %v179_v22 }
  0xa7   : > { %192 = vst.msk [vmem:[%s147_s5] sm:$0xff] %vm191_vm0, %v190_v23 }
  0xa8   : > { %348 = shalt.err (!%p345_p3)
}
  0xa9   : > { %s349_s23 = scalar_lea.hbm %s479_s14, 128  ;;  %s353_s26 = scalar_lea.hbm %s523_s2, 256 }
  0xaa   : > { %p350_p4 = scmp.ne.s32.totalorder %s479_s14, %s349_s23  ;;  %p354_p9 = scmp.lt.u32.totalorder %s479_s14, %s523_s2 }
  0xab   : > { %p355_p10 = scmp.lt.u32.totalorder %s353_s26, %s349_s23  ;;  %p357_p12 = scmp.lt.u32.totalorder %s349_s23, %s479_s14 }
  0xac   : > { %p351_p7 = pnand %p350_p4, %p456_p5 }
  0xad   : > { %p356_p11 = por %p355_p10, %p354_p9 }
  0xae   : > { %p352_p8 = pneg %p351_p7 }
  0xaf   : > { %p358_p13 = por %p357_p12, %p356_p11 }
  0xb1   : > { %p359_p0 = pnand %p358_p13, %p352_p8 }
  0xb3   : > { %362 = shalt.err (!%p359_p0)
}
  0xb4   : > { %289 = dma.vmem_to_hbm [thread:$0]  (%p456_p5), %s481_s6, 128, %s479_s14, %s194_s16  }
  0xb5 PF: > { %p295_p1 = scmp.ge.s32.totalorder %s397_s12, 2  ;;  %s219_s29 = sand.u32 1, %s385_s9  }
  0xb6   : > { %s220_s30 = scalar_lea.sflag [#allocation3], %s219_s29 }
  0xb7   : > { %p292_p2 = pnand %p295_p1, %p460_p6 }
  0xb9   : > { %380 = dma.done.wait (!%p292_p2), %s220_s30, 128  }
  0xba   : > { %382 = vsyncadd (!%p292_p2), %s220_s30, 4294967168  ;;  %p12_p3 = scmp.ge.s32.totalorder %s443_s15, 4   ;;  %s526_s9 = smov %s389_s10 }
  0xbb   : > { %s527_s10 = smov %s393_s11  ;;  %s528_s11 = smov %s454_s18 }
  0xbc   : > { %s529_s12 = smov %s443_s15  ;;  %14 = sbr.rel (!%p12_p3) target bundleno = 3 (0x3), region = 66 }
  0xc3   :  { %225 = vsyncpa [#allocation3], 1 }
  0xc4   :  { %227 = vsyncpa [#allocation3 + $0x1], 1 }

</bundles_post_ra>
